<compile_context>
chip_gen: v5e
topology: v5e:2x2
jax: 0.10.0
libtpu: 0.0.40
codegen_flags: <defaults>
</compile_context>

<pallas_src>
import jax
import jax.numpy as jnp
from jax.experimental import pallas as pl
from jax.experimental.pallas import tpu as pltpu


def make_mmoe_kernel(EH, L, GT):
    """Fused MMoE forward kernel (operates on the last batch element's S rows).

    Static column layouts of the fused inputs:
      w_in (C+1, EH + 2L): [expert layer-1 | head bias, tiled | gate logits, expanded]
      aux  (L,  EH + 2GT): [layer-2+head weight (transposed) | C_mix | C_den]
    Output lane g*T + t; intermediate lane index g*E*T + e*T + t.
    """

    def kernel(xa_ref, win_ref, aux_ref, out_ref):
        xa = xa_ref[...]                                                 # (S, C+1)

        # ---- ONE fused matmul: expert layer-1 pre-acts, per-expert head bias
        #      (broadcast via the ones column) and the pre-expanded gate logits.
        z = jnp.dot(xa, win_ref[...],
                    preferred_element_type=jnp.float32)                  # (S, EH+2L)
        h1 = jnp.maximum(z[:, :EH], 0.0)                                 # (S, EH)  ReLU
        bias_t = z[:, EH:EH + L]                                         # (S, L)
        logit = z[:, EH + L:EH + 2 * L]                                  # (S, L)

        # ---- fused expert layer-2 + output head; lane-dense transposed weight
        #      (trans_b matmul), pre-tiled across the G gate groups.
        w2t = aux_ref[:, :EH]                                            # (L, EH)
        y = jax.lax.dot_general(
            h1, w2t, (((1,), (1,)), ((), ())),
            preferred_element_type=jnp.float32) + bias_t                 # (S, L)

        # ---- vectorized per-gate softmax with deferred normalization:
        #      out[g,t] = sum_e exp(l_ge) * y_et / sum_e exp(l_ge)
        #      (a single global row-max is a constant shift within every group).
        m = jnp.max(logit, axis=-1, keepdims=True)                       # (S, 1)
        p = jnp.exp(logit - m)                                           # (S, L)
        c_mix = aux_ref[:, EH:EH + GT]                                   # (L, GT)
        c_den = aux_ref[:, EH + GT:EH + 2 * GT]                          # (L, GT)
        raw = jnp.dot(p * y, c_mix, preferred_element_type=jnp.float32)  # (S, GT)
        den = jnp.dot(p, c_den, preferred_element_type=jnp.float32)      # (S, GT)
        out_ref[...] = raw / den                                         # single store

    return kernel


def fuse_mmoe_params(params):
    """One-time fusion of MMoEDecoder weights into the two kernel operands.

    Call once per parameter set and cache the result; this is plain XLA and is
    deliberately kept out of the per-forward path.
    """
    w1, b1, w2, b2, wg, bg, wo, bo = params
    E, C, H = w1.shape
    G = wg.shape[0]
    T = wo.shape[1]
    EH, GT, L = E * H, G * T, G * E * T
    f32 = jnp.float32

    # --- w_in: [E*H expert cols | L bias cols | L gate cols], biases in a ones row.
    w1cat = jnp.transpose(w1, (1, 0, 2)).reshape(C, EH)                  # col e*H+h
    b1cat = b1.reshape(1, EH)
    # gate columns pre-expanded across the T output lanes: col g*E*T + e*T + t
    wg_exp = jnp.repeat(jnp.transpose(wg, (1, 0, 2)).reshape(C, G * E), T, axis=1)
    bg_exp = jnp.repeat(bg.reshape(1, G * E), T, axis=1)
    # per-expert head bias (b2[e]@wo + bo), tiled across the G groups; adding bo
    # per expert block is exact because the gate softmax weights sum to 1.
    bias_et = (b2[:, 0, :] @ wo + bo[0]).reshape(1, E * T)
    bias_tl = jnp.tile(bias_et, (1, G))                                   # (1, L)
    w_in = jnp.concatenate(
        [jnp.concatenate([w1cat, jnp.zeros((C, L), f32), wg_exp], axis=1),
         jnp.concatenate([b1cat, bias_tl, bg_exp], axis=1)], axis=0)      # (C+1, EH+2L)

    # --- aux: transposed block-diag_e(w2[e]@wo) tiled across G, plus the mixture
    #     and denominator reduction indicators riding in its spare lanes.
    w_eth = jnp.einsum('ehk,kt->eth', w2, wo)                             # (E, T, H)
    blk = w_eth[:, :, None, :] * jnp.eye(E, dtype=f32)[:, None, :, None]  # (E,T,E',H)
    w2t = jnp.tile(blk.reshape(E * T, EH), (G, 1))                        # (L, EH)

    i = jnp.arange(L)
    j = jnp.arange(GT)
    gi, ti = i // (E * T), i % T
    gj, tj = j // T, j % T
    same_g = gi[:, None] == gj[None, :]
    c_mix = (same_g & (ti[:, None] == tj[None, :])).astype(f32)           # (L, GT)
    c_den = (same_g & (ti[:, None] == 0)).astype(f32)                     # (L, GT)
    aux = jnp.concatenate([w2t, c_mix, c_den], axis=1)                    # (L, EH+2GT)

    return w_in, aux, (E, H, G, T)


def mmoe_forward(x, fused, pred_len, c_out):
    """Full MMoEDecoder.forward: experts -> gates -> OutputBlock -> reshape."""
    w_in, aux, (E, H, G, T) = fused
    B, S, C = x.shape
    EH, GT, L = E * H, G * T, G * E * T

    # dead-row elimination: OutputBlock('soft_sensor') applies x[:, -1] to the
    # (G, B, S, H) mixture, i.e. only the LAST BATCH element's S rows ever reach
    # the output head -> the kernel runs on (S, C+1) only.
    ones = jnp.ones((S, 1), jnp.float32)
    x_aug = jnp.concatenate([x[B - 1].astype(jnp.float32), ones], axis=-1)  # (S, C+1)

    vmem = pl.BlockSpec(memory_space=pltpu.MemorySpace.VMEM)
    out2d = pl.pallas_call(
        make_mmoe_kernel(EH, L, GT),
        out_shape=jax.ShapeDtypeStruct((S, GT), jnp.float32),
        in_specs=[vmem, vmem, vmem],
        out_specs=vmem,
    )(x_aug, w_in, aux)

    # layout plumbing outside the kernel: (S, G*T) -> (G, S, T) -> module output
    out = jnp.transpose(out2d.reshape(S, G, T), (1, 0, 2))                  # (G, S, T)
    return out.reshape(-1, pred_len, c_out)


def reference_forward(x, params, pred_len, c_out):
    """Pure-JAX reference replicating the PyTorch forward semantics exactly."""
    B, S, C = x.shape
    w1, b1, w2, b2, wg, bg, wo, bo = params
    E = w1.shape[0]
    G = wg.shape[0]
    H = w1.shape[2]

    x2 = x.reshape(B * S, C)
    exps = []
    for e in range(E):
        h = jnp.maximum(x2 @ w1[e] + b1[e, 0], 0.0)
        h = h @ w2[e] + b2[e, 0]
        exps.append(h)
    exp_stack = jnp.stack(exps, axis=0)                                    # (E, N, H)

    outs = []
    for g in range(G):
        sc = jax.nn.softmax(x2 @ wg[g] + bg[g, 0], axis=-1)                # (N, E)
        mixed = jnp.einsum('ne,enh->nh', sc, exp_stack)                    # (N, H)
        last = mixed.reshape(B, S, H)[-1]                                  # (S, H)  <- x[:, -1]
        outs.append(last @ wo + bo[0])                                     # (S, T)
    out = jnp.stack(outs, axis=0)                                          # (G, S, T)
    return out.reshape(-1, pred_len, c_out)


if __name__ == "__main__":
    # config (small, consistent with the module):
    B, S, C = 2, 8, 4          # batch, seq_len, c_in (enc_in)
    H = 32                     # exp_hidden
    E = 4                      # n_exp
    pred_len, c_out = 2, 2
    T = pred_len * c_out       # n_task (== number of gates G and output dim)
    G = T

    key = jax.random.PRNGKey(0)
    ks = jax.random.split(key, 10)
    scale = 0.1
    x = jax.random.normal(ks[0], (B, S, C), jnp.float32)

    # weights stored as (in, out) so y = x @ W + b  (same math as nn.Linear)
    w1 = scale * jax.random.normal(ks[1], (E, C, H), jnp.float32)
    b1 = scale * jax.random.normal(ks[2], (E, 1, H), jnp.float32)
    w2 = scale * jax.random.normal(ks[3], (E, H, H), jnp.float32)
    b2 = scale * jax.random.normal(ks[4], (E, 1, H), jnp.float32)
    wg = scale * jax.random.normal(ks[5], (G, C, E), jnp.float32)
    bg = scale * jax.random.normal(ks[6], (G, 1, E), jnp.float32)
    wo = scale * jax.random.normal(ks[7], (H, T), jnp.float32)
    bo = scale * jax.random.normal(ks[8], (1, T), jnp.float32)
    params = (w1, b1, w2, b2, wg, bg, wo, bo)

    # weight fusion hoisted out of the per-call path (cache per parameter set)
    fused = fuse_mmoe_params(params)
    fused = jax.tree_util.tree_map(
        lambda a: jax.block_until_ready(a) if isinstance(a, jax.Array) else a, fused)

    out = mmoe_forward(x, fused, pred_len, c_out)
    out = jax.block_until_ready(out)

    ref = reference_forward(x, params, pred_len, c_out)
    assert out.shape == (G * S, pred_len, c_out), out.shape
    assert jnp.allclose(out, ref, atol=1e-5, rtol=1e-4), (
        float(jnp.max(jnp.abs(out - ref))))

    print("KERNEL_OK")
</pallas_src>

<mosaic_0001>
module attributes {stable_mosaic.version = 11 : i64} {
  func.func @kernel(%arg0: memref<8x5xf32, #tpu.memory_space<vmem>>, %arg1: memref<5x256xf32, #tpu.memory_space<vmem>>, %arg2: memref<64x160xf32, #tpu.memory_space<vmem>>, %arg3: memref<8x16xf32, #tpu.memory_space<vmem>>) attributes {dimension_semantics = [], scalar_prefetch = 0 : i64, scratch_operands = 0 : i64, tpu.core_type = #tpu.core_type<tc>} {
    %c0 = arith.constant 0 : index
    %c0_0 = arith.constant 0 : index
    %0 = vector.load %arg0[%c0, %c0_0] : memref<8x5xf32, #tpu.memory_space<vmem>>, vector<8x5xf32>
    %c0_1 = arith.constant 0 : index
    %c0_2 = arith.constant 0 : index
    %1 = vector.load %arg1[%c0_1, %c0_2] : memref<5x256xf32, #tpu.memory_space<vmem>>, vector<5x256xf32>
    %cst = arith.constant dense<0.000000e+00> : vector<8x256xf32>
    %2 = tpu.matmul %0, %1, %cst {dimension_numbers = #tpu.dot_dimension_numbers<[1], [0], [0], [1], [0, 0, 1, 1], [], []>} : vector<8x5xf32>, vector<5x256xf32>, vector<8x256xf32> -> vector<8x256xf32>
    %3 = vector.extract_strided_slice %2 {offsets = [0, 0], sizes = [8, 128], strides = [1, 1]} : vector<8x256xf32> to vector<8x128xf32>
    %cst_3 = arith.constant 0.000000e+00 : f32
    %4 = vector.broadcast %cst_3 : f32 to vector<8x128xf32>
    %5 = arith.maximumf %3, %4 : vector<8x128xf32>
    %6 = vector.extract_strided_slice %2 {offsets = [0, 128], sizes = [8, 64], strides = [1, 1]} : vector<8x256xf32> to vector<8x64xf32>
    %7 = vector.extract_strided_slice %2 {offsets = [0, 192], sizes = [8, 64], strides = [1, 1]} : vector<8x256xf32> to vector<8x64xf32>
    %c0_4 = arith.constant 0 : index
    %c0_5 = arith.constant 0 : index
    %8 = vector.load %arg2[%c0_4, %c0_5] : memref<64x160xf32, #tpu.memory_space<vmem>>, vector<64x128xf32>
    %cst_6 = arith.constant dense<0.000000e+00> : vector<8x64xf32>
    %9 = tpu.matmul %5, %8, %cst_6 {dimension_numbers = #tpu.dot_dimension_numbers<[1], [1], [0], [0], [0, 0, 1, 0], [], []>} : vector<8x128xf32>, vector<64x128xf32>, vector<8x64xf32> -> vector<8x64xf32>
    %10 = arith.addf %9, %6 : vector<8x64xf32>
    %cst_7 = arith.constant dense<0xFF800000> : vector<8xf32>
    %11 = vector.multi_reduction <maximumf>, %7, %cst_7 [1] : vector<8x64xf32> to vector<8xf32>
    %12 = vector.shape_cast %11 : vector<8xf32> to vector<8x1xf32>
    %13 = vector.broadcast %12 : vector<8x1xf32> to vector<8x64xf32>
    %14 = arith.subf %7, %13 : vector<8x64xf32>
    %15 = math.exp %14 : vector<8x64xf32>
    %c0_8 = arith.constant 0 : index
    %c128 = arith.constant 128 : index
    %16 = vector.load %arg2[%c0_8, %c128] : memref<64x160xf32, #tpu.memory_space<vmem>>, vector<64x16xf32>
    %c0_9 = arith.constant 0 : index
    %c144 = arith.constant 144 : index
    %17 = vector.load %arg2[%c0_9, %c144] : memref<64x160xf32, #tpu.memory_space<vmem>>, vector<64x16xf32>
    %18 = arith.mulf %15, %10 : vector<8x64xf32>
    %cst_10 = arith.constant dense<0.000000e+00> : vector<8x16xf32>
    %19 = tpu.matmul %18, %16, %cst_10 {dimension_numbers = #tpu.dot_dimension_numbers<[1], [0], [0], [1], [0, 0, 1, 1], [], []>} : vector<8x64xf32>, vector<64x16xf32>, vector<8x16xf32> -> vector<8x16xf32>
    %cst_11 = arith.constant dense<0.000000e+00> : vector<8x16xf32>
    %20 = tpu.matmul %15, %17, %cst_11 {dimension_numbers = #tpu.dot_dimension_numbers<[1], [0], [0], [1], [0, 0, 1, 1], [], []>} : vector<8x64xf32>, vector<64x16xf32>, vector<8x16xf32> -> vector<8x16xf32>
    %21 = arith.divf %19, %20 : vector<8x16xf32>
    %c0_12 = arith.constant 0 : index
    %c0_13 = arith.constant 0 : index
    %22 = vector.load %arg3[%c0_12, %c0_13] : memref<8x16xf32, #tpu.memory_space<vmem>>, vector<8x16xf32>
    tpu.vector_store %arg3[%c0_12, %c0_13], %21 {strides = array<i32>} : memref<8x16xf32, #tpu.memory_space<vmem>>, vector<8x16xf32>,
    return
  }
}

</mosaic_0001>

<bundles_post_ra>
// kernel: tpu_custom_call.1
= control target key start
LH: loop header
LB: loop body
LE: loop exit
PB: predicated region body
PF: predicated region fallthrough
CT: control target
= control target key end

     0   :  { %8 = vsyncpa [#allocation3], 0  ;;  %s459_s0 = inlined_call_operand.hbm [shape: f32[8,5], index: 0, kind: input, shape index: {}]   ;;  %s460_s1 = inlined_call_operand.hbm [shape: f32[5,256], index: 1, kind: input, shape index: {}]   ;;  %s461_s2 = inlined_call_operand.hbm [shape: f32[64,160], index: 2, kind: input, shape index: {}]   ;;  %s462_s3 = inlined_call_operand.hbm [shape: f32[8,16], index: 3, kind: output, shape index: {}]  }
   0x1   :  { %9 = vsyncpa [#allocation6], 0  ;;  %s27_s14 = sshll.u32 %s460_s1, 4  ;;  %s28_s14 = int_to_ptr.hbm [resolvable:$true] %s27_s14 }
   0x2   :  { %10 = vsyncpa [#allocation4], 0  ;;  %s419_s15 = smov [#allocation5]   ;;  %s16_s19 = sshll.u32 %s459_s0, 4  ;;  %s17_s19 = int_to_ptr.hbm [resolvable:$true] %s16_s19 }
   0x3   :  { %s29_s16 = sshll.u32 %s419_s15, 4  ;;  %s420_s20 = smov [#allocation2]   ;;  %s30_s16 = int_to_ptr.vmem [resolvable:$true] %s29_s16 }
   0x4   :  { %32 = dma.hbm_to_vmem [thread:$0]  %s28_s14, 256, %s30_s16, [#allocation6]  }
   0x5   :  { %s18_s21 = sshll.u32 %s420_s20, 4  ;;  %s37_s24 = sshll.u32 %s461_s2, 4  ;;  %s19_s21 = int_to_ptr.vmem [resolvable:$true] %s18_s21  ;;  %s38_s24 = int_to_ptr.hbm [resolvable:$true] %s37_s24 }
   0x6   :  { %21 = dma.hbm_to_vmem [thread:$0]  %s17_s19, 128, %s19_s21, [#allocation3]  }
   0x7   :  { %s421_s1 = smov [#allocation7]   ;;  %s422_s26 = smov 256  }
   0x8   :  { %s39_s25 = sshll.u32 %s421_s1, 4  ;;  %s423_s27 = smov 16   ;;  %s40_s25 = int_to_ptr.vmem [resolvable:$true] %s39_s25 }
   0x9   :  { %45 = dma.hbm_to_vmem [thread:$0]  %s38_s24, 2048, %s40_s25, [#allocation6], %s422_s26, %s422_s26, %s423_s27  }
   0xa   :  { %413 = dma.done.wait [#allocation3], 128  }
   0xb   :  { %414 = vsyncadd [#allocation3], 4294967168 }
   0xc   :  { %415 = dma.done.wait [#allocation6], 2304  }
   0xd   :  { %416 = vsyncadd [#allocation6], 4294964992  ;;  %vm65_vm0 = vcmask 1044480   ;;  %vm61_vm1 = vcmask 39936   ;;  %v59_v0 = vld [vmem:[#allocation5] sm:$0x1f] }
   0xe   :  { %v60_v1 = vld [vmem:[#allocation5 + $0x8] sm:$0x1f]  ;;  %v58_v2 = vld [vmem:[#allocation2] sm:$0xff]  ;;  %279 = vmatpush.msk.msra.mxu0 %vm65_vm0, %v59_v0  ;;  %v120_v3 = vld [vmem:[#allocation7 + $0x70] sm:$0xff]  ;;  %s424_s0 = smov 112   ;;  %vm141_vm2 = vcmask 1048064  }
   0xf   :  { %281 = vmatpush.msk.msra.mxu1 %vm65_vm0, %v60_v1  ;;  %280 = vmatmul.msk.f32.vlgmr.msra.gmra.mxu0 %vm61_vm1, %v58_v2  ;;  %v119_v4 = vld [vmem:[#allocation7 + $0x60] sm:$0xff]  ;;  %v118_v5 = vld [vmem:[#allocation7 + $0x50] sm:$0xff]  ;;  %v154_v11 = vld [vmem:[#allocation7 + $0x68] sm:$0xff]  ;;  %s425_s2 = smov 64   ;;  %vm164_vm3 = vcmask 523264   ;;  %s426_s28 = smov [#allocation8]  }
  0x10   :  { %282 = vmatmul.msk.f32.vlgmr.msra.gmra.mxu1 %vm61_vm1, %v58_v2  ;;  %129 = vmatpush.xpose.msra.mxu2 %v120_v3  ;;  %v117_v6 = vld [vmem:[#allocation7 + $0x40] sm:$0xff]  ;;  %v116_v7 = vld [vmem:[#allocation7 + $0x30] sm:$0xff]  ;;  %v155_v12 = vld [vmem:[#allocation7 + $0x78] sm:$0xff]  ;;  %s266_s29 = sshll.u32 %s426_s28, 4  ;;  %s268_s5 = sshll.u32 %s462_s3, 4  ;;  %vm259_vm8 = vcmask 130048   ;;  %s267_s29 = int_to_ptr.vmem [resolvable:$true] %s266_s29  ;;  %s269_s5 = int_to_ptr.hbm [resolvable:$true] %s268_s5 }
  0x11   :  { %v115_v8 = vld [vmem:[#allocation7 + $0x20] sm:$0xff]  ;;  %v114_v9 = vld [vmem:[#allocation7 + $0x10] sm:$0xff]  ;;  %v293_v13 = vpack.i.bf16 %v154_v11, %v155_v12  ;;  %175 = vmatpush.msra.mxu3 %v155_v12  ;;  %v152_v14 = vld [vmem:[#allocation7 + $0x48] sm:$0xff] }
  0x12   :  { %v113_v10 = vld [vmem:[#allocation7] sm:$0xff]  ;;  %v153_v15 = vld [vmem:[#allocation7 + $0x58] sm:$0xff]  ;;  %v150_v21 = vld [vmem:[#allocation7 + $0x28] sm:$0xff] }
  0x13   :  { %294 = vrot.lane.b32.xlu1 %v293_v13, %s424_s0  ;;  %176 = vmatpush.msra.mxu3 %v154_v11  ;;  %v298_v16 = vpack.i.bf16 %v152_v14, %v153_v15  ;;  %v151_v22 = vld [vmem:[#allocation7 + $0x38] sm:$0xff]  ;;  %v148_v26 = vld [vmem:[#allocation7 + $0x8] sm:$0xff] }
  0x14   :  { %130 = vmatpush.xpose.msra.mxu2 %v119_v4  ;;  %v303_v24 = vpack.i.bf16 %v150_v21, %v151_v22  ;;  %v149_v27 = vld [vmem:[#allocation7 + $0x18] sm:$0xff] }
  0x15   :  { %177 = vmatpush.msra.mxu3 %v153_v15  ;;  %v308_v28 = vpack.i.bf16 %v148_v26, %v149_v27 }
  0x16   :  { %304 = vrot.lane.b32.xlu2 %v303_v24, %s424_s0 }
  0x17   :  { %178 = vmatpush.msra.mxu3 %v152_v14 }
  0x18   :  { %131 = vmatpush.xpose.msra.mxu2 %v118_v5 }
  0x19   :  { %179 = vmatpush.msra.mxu3 %v151_v22 }
  0x1b   :  { %299 = vrot.lane.b32.xlu1 %v298_v16, %s424_s0  ;;  %180 = vmatpush.msra.mxu3 %v150_v21 }
  0x1c   :  { %132 = vmatpush.xpose.msra.mxu2 %v117_v6 }
  0x1d   :  { %181 = vmatpush.msra.mxu3 %v149_v27 }
  0x1e   :  { %309 = vrot.lane.b32.xlu2 %v308_v28, %s424_s0 }
  0x1f   :  { %182 = vmatpush.msra.mxu3 %v148_v26 }
  0x20   :  { %133 = vmatpush.xpose.msra.mxu2 %v116_v7 }
  0x24   :  { %134 = vmatpush.xpose.msra.mxu2 %v115_v8 }
  0x28   :  { %135 = vmatpush.xpose.msra.mxu2 %v114_v9 }
  0x2c   :  { %136 = vmatpush.xpose.msra.mxu2 %v113_v10 }
  0x70   :  { %v305_v39 = vpop.permute.xlu2 %304 }
  0x71   :  { %v306_v40 = vunpack.i.l.bf16 %v305_v39  ;;  %v307_v41 = vunpack.i.h.bf16 %v305_v39 }
  0x78   :  { %v310_v42 = vpop.permute.xlu2 %309 }
  0x79   :  { %v311_v43 = vunpack.i.l.bf16 %v310_v42  ;;  %v312_v44 = vunpack.i.h.bf16 %v310_v42 }
  0x85   :  { %v295_v23 = vpop.permute.xlu1 %294 }
  0x86   :  { %v296_v25 = vunpack.i.l.bf16 %v295_v23  ;;  %v297_v36 = vunpack.i.h.bf16 %v295_v23 }
  0x88   :  { %232 = vmatpush.msrb.mxu0 %v296_v25 }
  0x8a   :  { %233 = vmatpush.msrb.mxu0 %v297_v36 }
  0x8c   :  { %v89_v17 = vpop.f32.mrf.mxu0 }
  0x8d   :  { %v109_v18 = vpop.f32.mrf.mxu1  ;;  %v112_v19 = vmax.f32 %v89_v17, 0.0  ;;  %v300_v35 = vpop.permute.xlu1 %299 }
  0x8e   :  { %v142_v20 = vsel %vm141_vm2, %v109_v18, -inf  ;;  %v301_v37 = vunpack.i.l.bf16 %v300_v35  ;;  %v302_v38 = vunpack.i.h.bf16 %v300_v35 }
  0x8f   :  { %143 = vmax.xlane.f32.xlu0 %v142_v20  ;;  %137 = vmatmul.f32.vlgmr.msra.gmra.mxu2 %v112_v19 }
  0x90   :  { %234 = vmatpush.msrb.mxu0 %v301_v37 }
  0x92   :  { %235 = vmatpush.msrb.mxu0 %v302_v38 }
  0x94   :  { %236 = vmatpush.msrb.mxu0 %v306_v40 }
  0x96   :  { %237 = vmatpush.msrb.mxu0 %v307_v41 }
  0x98   :  { %238 = vmatpush.msrb.mxu0 %v311_v43 }
  0x9a   :  { %239 = vmatpush.msrb.mxu0 %v312_v44 }
 0x102   :  { %v144_v29 = vpop.xlane.xlu0 %143 }
 0x103   :  { %v145_v30 = vsub.f32 %v109_v18, %v144_v29 }
 0x105   :  { %v146_v31 = vmul.f32 1.442695, %v145_v30 }
 0x107   :  { %313 = vpow2.f32 %v146_v31 }
 0x10d   :  { %v314_v32 = vpop.eup %313 }
 0x10e   :  { %188 = vrot.lane.b32.xlu1 %v314_v32, %s425_s2 }
 0x112   :  { %v138_v33 = vpop.f32.mrf.mxu2 }
 0x113   :  { %v139_v34 = vadd.f32 %v138_v33, %v109_v18 }
 0x115   :  { %157 = vrot.lane.b32.xlu0 %v139_v34, %s425_s2 }
 0x180   :  { %v189_v45 = vpop.permute.xlu1 %188 }
 0x181   :  { %284 = vmatmul.msk.f32.vlgmr.msrb.gmra.mxu0 %vm164_vm3, %v189_v45 }
 0x187   :  { %v158_v46 = vpop.permute.xlu0 %157 }
 0x188   :  { %v160_v47 = vmul.f32 %v314_v32, %v158_v46 }
 0x18a   :  { %162 = vrot.lane.b32.xlu2 %v160_v47, %s425_s2 }
 0x1e4   :  { %v163_v48 = vpop.permute.xlu2 %162 }
 0x1e5   :  { %283 = vmatmul.msk.f32.vlgmr.msra.gmra.mxu3 %vm164_vm3, %v163_v48 }
 0x1fe   :  { %v241_v49 = vpop.f32.mrf.mxu0 }
 0x1ff   :  { %315 = vrcp.f32 %v241_v49  ;;  %v255_v55 = vand.u32 2147483648, %v241_v49  ;;  %vm249_vm5 = vweird.f32 %v241_v49  ;;  %v253_v56 = vand.u32 2147483647, %v241_v49 }
 0x201   :  { %v256_v58 = vor.u32 1.1754944e-38, %v255_v55  ;;  %vm254_vm7 = vcmp.eq.f32.partialorder %v253_v56, 8.507059e+37 }
 0x205   :  { %v316_v50 = vpop.eup %315 }
 0x206   :  { %v245_v51 = vmul.f32 %v316_v50, %v241_v49  ;;  %vm250_vm4 = vweird.f32 %v316_v50 }
 0x207   :  { %vm251_vm6 = vmor %vm249_vm5, %vm250_vm4 }
 0x208   :  { %v246_v52 = vsub.f32 1.0, %v245_v51 }
 0x20a   :  { %v247_v53 = vmul.f32 %v316_v50, %v246_v52 }
 0x20c   :  { %v248_v54 = vadd.f32 %v316_v50, %v247_v53 }
 0x20e   :  { %v252_v57 = vsel %vm251_vm6, %v316_v50, %v248_v54 }
 0x20f   :  { %v257_v60 = vsel %vm254_vm7, %v256_v58, %v252_v57 }
 0x268   :  { %v184_v59 = vpop.f32.mrf.mxu3 }
 0x269   :  { %v258_v61 = vmul.f32 %v257_v60, %v184_v59 }
 0x26b   :  { %260 = vst.msk [vmem:[#allocation8] sm:$0xff] %vm259_vm8, %v258_v61 }
 0x26c   :  { %271 = dma.vmem_to_hbm [thread:$0]  %s267_s29, 128, %s269_s5, [#allocation4]  }
 0x26d   :  { %417 = dma.done.wait [#allocation4], 128  }
 0x26e   :  { %418 = vsyncadd [#allocation4], 4294967168 }
 0x26f   :  { %276 = vsyncpa [#allocation3], 1 }
 0x270   :  { %277 = vsyncpa [#allocation6], 1 }
 0x271   :  { %278 = vsyncpa [#allocation4], 1 }

</bundles_post_ra>
